<compile_context>
chip_gen: v6e
topology: v6e:2x2x1
jax: 0.10.0
libtpu: 0.0.40
codegen_flags: <defaults>
</compile_context>

<pallas_src>
import functools

import jax
import jax.numpy as jnp
from jax import lax
from jax.experimental import pallas as pl
from jax.experimental.pallas import tpu as pltpu


def _drl_compute(x3, mask_row, wd, wp, pcol, eps):
    """Shared math on one (batch, T-tile) block.

    x3:       (3D, Tt) stacked taps [x(t-d); x(t); x(t+d)]  (f32)
    mask_row: (1, Tt) or None
    wd:       (D, 3D) fused dilated-conv weight (out, 3*in)
    wp:       (D, D)  1x1-conv weight (out, in)
    pcol:     (D, 4)  packed [b_dilated, b_1x1, gamma, beta] columns
    """
    D = wp.shape[0]
    bd = pcol[:, 0:1]
    bp = pcol[:, 1:2]
    gmm = pcol[:, 2:3]
    bet = pcol[:, 3:4]

    # Dilated conv, all 3 taps in a single MXU call (K = 3D), f32 accumulation.
    h = jnp.dot(wd, x3, preferred_element_type=jnp.float32) + bd
    h = jnp.maximum(h, 0.0)                     # ReLU

    # 1x1 conv.
    out = jnp.dot(wp, h, preferred_element_type=jnp.float32) + bp

    # Residual; center tap (rows D:2D of x3) is the original x.
    res = x3[D:2 * D, :] + out
    if mask_row is not None:
        res = res * mask_row                    # (D, Tt) * (1, Tt)

    # LayerNorm over channels (sublane axis), biased variance, eps inside rsqrt.
    mean = jnp.mean(res, axis=0, keepdims=True)
    var = jnp.mean(jnp.square(res - mean), axis=0, keepdims=True)
    xn = (res - mean) * lax.rsqrt(var + eps)
    return xn * gmm + bet


def _kernel_nomask(x3_ref, wd_ref, wp_ref, pcol_ref, o_ref, *, eps):
    y = _drl_compute(x3_ref[...], None, wd_ref[...], wp_ref[...], pcol_ref[...], eps)
    o_ref[...] = y.astype(o_ref.dtype)


def _kernel_mask(x3_ref, mask_ref, wd_ref, wp_ref, pcol_ref, o_ref, *, eps):
    y = _drl_compute(x3_ref[...], mask_ref[...], wd_ref[...], wp_ref[...],
                     pcol_ref[...], eps)
    o_ref[...] = y.astype(o_ref.dtype)


def _choose_t_tile(T, D):
    """Lane-dense T tile: multiple of 128, sized so the double-buffered
    input/output blocks stay well inside scoped VMEM (v7x: 64 MiB physical)."""
    budget = 16 * 1024 * 1024                   # bytes for in+out blocks
    bytes_per_col = (3 * D + D) * 4 * 2         # f32, double-buffered
    cap = (budget // bytes_per_col) // 128 * 128
    cap = max(128, min(1024, cap))
    if T <= cap:
        return T                                # full-T block is always legal
    return cap


def dilated_residual_layer(x, params, *, dilation, eps=1e-5, mask=None,
                           t_tile=None):
    """x: (B, D, T) float32 (PyTorch NCL convention). Returns (B, D, T)."""
    B, D, T = x.shape
    w_dil, b_dil, w_1x1, b_1x1, gamma, beta = params
    d = int(dilation)

    # Pad time by `dilation` on each side, then stack the 3 conv taps along
    # channels so the kernel needs no halo handling and one fused K=3D matmul.
    x_pad = jnp.pad(x, ((0, 0), (0, 0), (d, d)))                  # (B, D, T+2d)
    x3 = jnp.concatenate(
        [x_pad[:, :, 0:T],                # tap 0: x(t - d)
         x_pad[:, :, d:d + T],            # tap 1: x(t)      (center / residual)
         x_pad[:, :, 2 * d:2 * d + T]],   # tap 2: x(t + d)
        axis=1)                                                   # (B, 3D, T)

    # Conv1d weight is (out, in, k); fuse taps -> (out, 3*in), rows match x3.
    wd = jnp.transpose(w_dil, (0, 2, 1)).reshape(D, 3 * D)        # (D, 3D)
    wp = w_1x1[:, :, 0]                                           # (D, D)
    pcol = jnp.stack([b_dil, b_1x1, gamma, beta], axis=1)         # (D, 4)

    if t_tile is None:
        t_tile = _choose_t_tile(T, D)
    tt = int(t_tile)
    n_t = pl.cdiv(T, tt)

    x3_spec = pl.BlockSpec((None, 3 * D, tt), lambda b, t: (b, 0, t))
    out_spec = pl.BlockSpec((None, D, tt), lambda b, t: (b, 0, t))
    weight_specs = [
        pl.BlockSpec((D, 3 * D), lambda b, t: (0, 0)),   # resident across grid
        pl.BlockSpec((D, D), lambda b, t: (0, 0)),
        pl.BlockSpec((D, 4), lambda b, t: (0, 0)),
    ]

    if mask is None:
        kernel = functools.partial(_kernel_nomask, eps=eps)
        in_specs = [x3_spec] + weight_specs
        args = (x3, wd, wp, pcol)
    else:
        # PyTorch uses mask[:, 0:1, :] with mask shape (B, C, T) -> lane-dense row.
        mask_b1t = mask[:, 0:1, :].astype(x.dtype)                # (B, 1, T)
        kernel = functools.partial(_kernel_mask, eps=eps)
        mask_spec = pl.BlockSpec((None, 1, tt), lambda b, t: (b, 0, t))
        in_specs = [x3_spec, mask_spec] + weight_specs
        args = (x3, mask_b1t, wd, wp, pcol)

    # Explicit scoped-VMEM budget: double-buffered blocks + resident weights.
    block_bytes = 4 * (3 * D * tt + D * tt)
    if mask is not None:
        block_bytes += 4 * 8 * tt
    resident_bytes = 4 * (3 * D * D + D * D + D * 128)
    vmem_limit = int(min(max(2 * (block_bytes + resident_bytes) + (4 << 20),
                             32 << 20), 100 << 20))

    return pl.pallas_call(
        kernel,
        out_shape=jax.ShapeDtypeStruct((B, D, T), x.dtype),
        grid_spec=pltpu.PrefetchScalarGridSpec(
            num_scalar_prefetch=0,
            grid=(B, n_t),
            in_specs=in_specs,
            out_specs=out_spec,
        ),
        compiler_params=pltpu.CompilerParams(
            dimension_semantics=("parallel", "parallel"),
            vmem_limit_bytes=vmem_limit,
        ),
    )(*args)


def _reference(x, params, *, dilation, eps=1e-5, mask=None):
    """Pure-JAX reference of the PyTorch forward (eval mode), (B, D, T) layout."""
    B, D, T = x.shape
    w_dil, b_dil, w_1x1, b_1x1, gamma, beta = params
    d = int(dilation)
    xp = jnp.pad(x, ((0, 0), (0, 0), (d, d)))
    hp = lax.Precision.HIGHEST
    h = (jnp.einsum("oi,bit->bot", w_dil[:, :, 0], xp[:, :, 0:T], precision=hp)
         + jnp.einsum("oi,bit->bot", w_dil[:, :, 1], xp[:, :, d:d + T], precision=hp)
         + jnp.einsum("oi,bit->bot", w_dil[:, :, 2], xp[:, :, 2 * d:2 * d + T], precision=hp)
         + b_dil[None, :, None])
    h = jnp.maximum(h, 0.0)
    out = jnp.einsum("oi,bit->bot", w_1x1[:, :, 0], h, precision=hp) + b_1x1[None, :, None]
    res = x + out
    if mask is not None:
        res = res * mask[:, 0:1, :]
    mean = jnp.mean(res, axis=1, keepdims=True)
    var = jnp.mean((res - mean) ** 2, axis=1, keepdims=True)
    return (res - mean) / jnp.sqrt(var + eps) * gamma[None, :, None] + beta[None, :, None]


if __name__ == "__main__":
    B, D, T = 2, 64, 256
    dilation = 4

    key = jax.random.PRNGKey(0)
    k_x, k_wd, k_bd, k_wp, k_bp, k_g, k_b, k_m = jax.random.split(key, 8)

    x = jax.random.normal(k_x, (B, D, T), dtype=jnp.float32)
    # Deterministic parameter init (shapes match nn.Conv1d / nn.LayerNorm).
    w_dil = jax.random.normal(k_wd, (D, D, 3), dtype=jnp.float32) * 0.1
    b_dil = jax.random.normal(k_bd, (D,), dtype=jnp.float32) * 0.1
    w_1x1 = jax.random.normal(k_wp, (D, D, 1), dtype=jnp.float32) * 0.1
    b_1x1 = jax.random.normal(k_bp, (D,), dtype=jnp.float32) * 0.1
    gamma = 1.0 + 0.1 * jax.random.normal(k_g, (D,), dtype=jnp.float32)
    beta = 0.1 * jax.random.normal(k_b, (D,), dtype=jnp.float32)
    params = (w_dil, b_dil, w_1x1, b_1x1, gamma, beta)

    # 1) No-mask path, forcing the T-tiled grid (t_tile=128 -> grid (2, 2)).
    y = dilated_residual_layer(x, params, dilation=dilation, eps=1e-5,
                               mask=None, t_tile=128)
    y = jax.block_until_ready(y)
    y_ref = _reference(x, params, dilation=dilation, eps=1e-5, mask=None)
    assert y.shape == (B, D, T)
    assert jnp.allclose(y, y_ref, atol=2e-4, rtol=2e-4)

    # 2) Mask path (binary time mask, broadcast to (B, C, T) like MS-TCN).
    mask = (jax.random.uniform(k_m, (B, 1, T)) > 0.2).astype(jnp.float32)
    mask = jnp.broadcast_to(mask, (B, D, T))
    ym = dilated_residual_layer(x, params, dilation=dilation, eps=1e-5, mask=mask)
    ym = jax.block_until_ready(ym)
    ym_ref = _reference(x, params, dilation=dilation, eps=1e-5, mask=mask)
    assert jnp.allclose(ym, ym_ref, atol=2e-4, rtol=2e-4)

    print("KERNEL_OK")
</pallas_src>

<mosaic_0001>
module attributes {stable_mosaic.version = 11 : i64} {
  func.func @_kernel_nomask(%arg0: i32, %arg1: i32, %arg2: memref<1x192x128xf32, #tpu.memory_space<vmem>>, %arg3: memref<64x192xf32, #tpu.memory_space<vmem>>, %arg4: memref<64x64xf32, #tpu.memory_space<vmem>>, %arg5: memref<64x4xf32, #tpu.memory_space<vmem>>, %arg6: memref<1x64x128xf32, #tpu.memory_space<vmem>>) attributes {dimension_semantics = [#tpu.dimension_semantics<parallel>, #tpu.dimension_semantics<parallel>], iteration_bounds = array<i64: 2, 2>, scalar_prefetch = 0 : i64, scratch_operands = 0 : i64, tpu.core_type = #tpu.core_type<tc>, window_params = [{transform_indices = @transform_0, window_bounds = array<i64: 1, 192, 128>}, {pipeline_mode = #tpu.pipeline_mode<synchronous>, transform_indices = @transform_1, window_bounds = array<i64: 64, 192>}, {pipeline_mode = #tpu.pipeline_mode<synchronous>, transform_indices = @transform_2, window_bounds = array<i64: 64, 64>}, {pipeline_mode = #tpu.pipeline_mode<synchronous>, transform_indices = @transform_3, window_bounds = array<i64: 64, 4>}, {transform_indices = @transform_4, window_bounds = array<i64: 1, 64, 128>}]} {
    %c0 = arith.constant 0 : index
    %c0_0 = arith.constant 0 : index
    %c0_1 = arith.constant 0 : index
    %0 = vector.load %arg2[%c0, %c0_0, %c0_1] : memref<1x192x128xf32, #tpu.memory_space<vmem>>, vector<1x192x128xf32>
    %1 = vector.shape_cast %0 : vector<1x192x128xf32> to vector<192x128xf32>
    %c0_2 = arith.constant 0 : index
    %c0_3 = arith.constant 0 : index
    %2 = vector.load %arg3[%c0_2, %c0_3] : memref<64x192xf32, #tpu.memory_space<vmem>>, vector<64x192xf32>
    %c0_4 = arith.constant 0 : index
    %c0_5 = arith.constant 0 : index
    %3 = vector.load %arg4[%c0_4, %c0_5] : memref<64x64xf32, #tpu.memory_space<vmem>>, vector<64x64xf32>
    %c0_6 = arith.constant 0 : index
    %c0_7 = arith.constant 0 : index
    %4 = vector.load %arg5[%c0_6, %c0_7] : memref<64x4xf32, #tpu.memory_space<vmem>>, vector<64x4xf32>
    %5 = vector.extract_strided_slice %4 {offsets = [0, 0], sizes = [64, 1], strides = [1, 1]} : vector<64x4xf32> to vector<64x1xf32>
    %6 = vector.extract_strided_slice %4 {offsets = [0, 1], sizes = [64, 1], strides = [1, 1]} : vector<64x4xf32> to vector<64x1xf32>
    %7 = vector.extract_strided_slice %4 {offsets = [0, 2], sizes = [64, 1], strides = [1, 1]} : vector<64x4xf32> to vector<64x1xf32>
    %8 = vector.extract_strided_slice %4 {offsets = [0, 3], sizes = [64, 1], strides = [1, 1]} : vector<64x4xf32> to vector<64x1xf32>
    %cst = arith.constant dense<0.000000e+00> : vector<64x128xf32>
    %9 = tpu.matmul %2, %1, %cst {dimension_numbers = #tpu.dot_dimension_numbers<[1], [0], [0], [1], [0, 0, 1, 1], [], []>} : vector<64x192xf32>, vector<192x128xf32>, vector<64x128xf32> -> vector<64x128xf32>
    %10 = vector.broadcast %5 : vector<64x1xf32> to vector<64x128xf32>
    %11 = arith.addf %9, %10 : vector<64x128xf32>
    %cst_8 = arith.constant 0.000000e+00 : f32
    %12 = vector.broadcast %cst_8 : f32 to vector<64x128xf32>
    %13 = arith.maximumf %11, %12 : vector<64x128xf32>
    %cst_9 = arith.constant dense<0.000000e+00> : vector<64x128xf32>
    %14 = tpu.matmul %3, %13, %cst_9 {dimension_numbers = #tpu.dot_dimension_numbers<[1], [0], [0], [1], [0, 0, 1, 1], [], []>} : vector<64x64xf32>, vector<64x128xf32>, vector<64x128xf32> -> vector<64x128xf32>
    %15 = vector.broadcast %6 : vector<64x1xf32> to vector<64x128xf32>
    %16 = arith.addf %14, %15 : vector<64x128xf32>
    %17 = vector.extract_strided_slice %1 {offsets = [64, 0], sizes = [64, 128], strides = [1, 1]} : vector<192x128xf32> to vector<64x128xf32>
    %18 = arith.addf %17, %16 : vector<64x128xf32>
    %cst_10 = arith.constant dense<0.000000e+00> : vector<128xf32>
    %19 = vector.multi_reduction <add>, %18, %cst_10 [0] : vector<64x128xf32> to vector<128xf32>
    %20 = vector.shape_cast %19 : vector<128xf32> to vector<1x128xf32>
    %cst_11 = arith.constant 6.400000e+01 : f32
    %21 = vector.broadcast %cst_11 : f32 to vector<1x128xf32>
    %22 = arith.divf %20, %21 : vector<1x128xf32>
    %23 = vector.broadcast %22 : vector<1x128xf32> to vector<64x128xf32>
    %24 = arith.subf %18, %23 : vector<64x128xf32>
    %25 = arith.mulf %24, %24 : vector<64x128xf32>
    %cst_12 = arith.constant dense<0.000000e+00> : vector<128xf32>
    %26 = vector.multi_reduction <add>, %25, %cst_12 [0] : vector<64x128xf32> to vector<128xf32>
    %27 = vector.shape_cast %26 : vector<128xf32> to vector<1x128xf32>
    %cst_13 = arith.constant 6.400000e+01 : f32
    %28 = vector.broadcast %cst_13 : f32 to vector<1x128xf32>
    %29 = arith.divf %27, %28 : vector<1x128xf32>
    %30 = vector.broadcast %22 : vector<1x128xf32> to vector<64x128xf32>
    %31 = arith.subf %18, %30 : vector<64x128xf32>
    %cst_14 = arith.constant 9.99999974E-6 : f32
    %32 = vector.broadcast %cst_14 : f32 to vector<1x128xf32>
    %33 = arith.addf %29, %32 : vector<1x128xf32>
    %34 = math.rsqrt %33 : vector<1x128xf32>
    %35 = vector.broadcast %34 : vector<1x128xf32> to vector<64x128xf32>
    %36 = arith.mulf %31, %35 : vector<64x128xf32>
    %37 = vector.broadcast %7 : vector<64x1xf32> to vector<64x128xf32>
    %38 = arith.mulf %36, %37 : vector<64x128xf32>
    %39 = vector.broadcast %8 : vector<64x1xf32> to vector<64x128xf32>
    %40 = arith.addf %38, %39 : vector<64x128xf32>
    %c0_15 = arith.constant 0 : index
    %c0_16 = arith.constant 0 : index
    %c0_17 = arith.constant 0 : index
    %41 = vector.load %arg6[%c0_15, %c0_16, %c0_17] : memref<1x64x128xf32, #tpu.memory_space<vmem>>, vector<1x64x128xf32>
    %42 = vector.shape_cast %41 : vector<1x64x128xf32> to vector<64x128xf32>
    %43 = vector.shape_cast %40 : vector<64x128xf32> to vector<1x64x128xf32>
    tpu.vector_store %arg6[%c0_15, %c0_16, %c0_17], %43 {strides = array<i32>} : memref<1x64x128xf32, #tpu.memory_space<vmem>>, vector<1x64x128xf32>,
    return
  }
  func.func @transform_0(%arg0: i32, %arg1: i32) -> (i32, i32, i32) {
    %c0_i32 = arith.constant 0 : i32
    %c0_i32_0 = arith.constant 0 : i32
    return %arg0, %c0_i32, %arg1 : i32, i32, i32
  }
  func.func @transform_1(%arg0: i32, %arg1: i32) -> (i32, i32) {
    %c0_i32 = arith.constant 0 : i32
    %c0_i32_0 = arith.constant 0 : i32
    %c0_i32_1 = arith.constant 0 : i32
    return %c0_i32, %c0_i32_0 : i32, i32
  }
  func.func @transform_2(%arg0: i32, %arg1: i32) -> (i32, i32) {
    %c0_i32 = arith.constant 0 : i32
    %c0_i32_0 = arith.constant 0 : i32
    %c0_i32_1 = arith.constant 0 : i32
    return %c0_i32, %c0_i32_0 : i32, i32
  }
  func.func @transform_3(%arg0: i32, %arg1: i32) -> (i32, i32) {
    %c0_i32 = arith.constant 0 : i32
    %c0_i32_0 = arith.constant 0 : i32
    %c0_i32_1 = arith.constant 0 : i32
    return %c0_i32, %c0_i32_0 : i32, i32
  }
  func.func @transform_4(%arg0: i32, %arg1: i32) -> (i32, i32, i32) {
    %c0_i32 = arith.constant 0 : i32
    %c0_i32_0 = arith.constant 0 : i32
    return %arg0, %c0_i32, %arg1 : i32, i32, i32
  }
}

</mosaic_0001>

<bundles_post_ra>
// kernel: tpu_custom_call.1
= control target key start
LH: loop header
LB: loop body
LE: loop exit
PB: predicated region body
PF: predicated region fallthrough
CT: control target
= control target key end

     0   :  { %s1702_s0 = inlined_call_operand.hbm [shape: f32[2,192,256], index: 0, kind: input, shape index: {}]   ;;  %s1703_s1 = inlined_call_operand.hbm [shape: f32[64,192], index: 1, kind: input, shape index: {}]   ;;  %s1704_s2 = inlined_call_operand.vmem [shape: f32[64,64], index: 2, kind: input, shape index: {}]   ;;  %s1705_s3 = inlined_call_operand.vmem [shape: f32[64,4], index: 3, kind: input, shape index: {}]   ;;  %s1706_s4 = inlined_call_operand.hbm [shape: f32[2,64,256], index: 4, kind: output, shape index: {}]  }
   0x1   :  { %1719 = sst [smem:[#allocation17_spill]] %s1703_s1 }
   0x2   :  { %9 = vsyncpa [#allocation3], 0 }
   0x3   :  { %11 = vsyncpa [#allocation3 + $0x1], 0 }
   0x4   :  { %12 = vsyncpa [#allocation6], 0 }
   0x5   :  { %13 = vsyncpa [#allocation4], 0 }
   0x6   :  { %15 = vsyncpa [#allocation4 + $0x1], 0  ;;  %s1291_s15 = smov 0   ;;  %s1293_s16 = smov 0  }
   0x7   :  { %s1295_s17 = smov 0   ;;  %s1297_s18 = smov 0  }
   0x8   :  { %s1299_s19 = smov 0   ;;  %s1301_s20 = smov 0  }
   0x9   :  { %s1303_s21 = smov 0   ;;  %s1305_s22 = smov 0  }
   0xa LB: > { %1720 = sst [smem:[#allocation11_spill]] %s1221_s15  ;;  %s907_s23 = sadd.s32 4294967295, %s1249_s22   ;;  %s1249_s22 = sphi %s1305_s22, %s21_s22   ;;  %s1245_s21 = sphi %s1303_s21, %s1753_s21   ;;  %s1241_s20 = sphi %s1301_s20, %s1752_s20   ;;  %s1237_s19 = sphi %s1299_s19, %s1751_s19   ;;  %s1233_s18 = sphi %s1297_s18, %s1750_s18   ;;  %s1229_s17 = sphi %s1295_s17, %s1749_s17   ;;  %s1225_s16 = sphi %s1293_s16, %s1748_s16   ;;  %s1221_s15 = sphi %s1291_s15, %s1747_s15  }
   0xb   : > { %1721 = sst [smem:[#allocation12_spill]] %s1249_s22  ;;  %s908_s24 = sadd.s32 4294967294, %s1249_s22  }
   0xc   : > { %p49_p0 = scmp.ne.s32.totalorder %s1229_s17, %s1225_s16  ;;  %p50_p1 = scmp.eq.s32.totalorder %s1249_s22, 0 }
   0xd   : > { %p55_p2 = scmp.ne.s32.totalorder %s1225_s16, %s1221_s15  ;;  %p1339_p3 = scmp.eq.s32.totalorder %s907_s23, 0 }
   0xe   : > { %p144_p4 = scmp.eq.s32.totalorder %s907_s23, 3  ;;  %p1343_p5 = por %p50_p1, %p49_p0 }
   0xf   : > { %p150_p6 = scmp.eq.s32.totalorder %s908_s24, 3  ;;  %p1349_p7 = por %p1339_p3, %p55_p2 }
  0x10   : > { %p1353_p8 = por %p144_p4, %p49_p0  ;;  %p909_p10 = scmp.ge.s32.totalorder %s1249_s22, 1 }
  0x11   : > { %s1724_s28 = scalar_select %p1349_p7, 1, 0 }
  0x12   : > { %s1725_s29 = scalar_select %p1353_p8, 1, 0 }
  0x13   : > { %p1357_p9 = por %p150_p6, %p55_p2  ;;  %p157_p11 = scmp.lt.s32.totalorder %s1249_s22, 5 }
  0x14   : > { %1726 = sst [smem:[#allocation13_spill]] %s1725_s29  ;;  %s1251_s6 = smov [#allocation5]  }
  0x15   : > { %s1727_s30 = scalar_select %p1357_p9, 1, 0 }
  0x16   : > { %p1363_p12 = pnand %p909_p10, %p157_p11  ;;  %s169_s7 = sshll.u32 %s1251_s6, 4  ;;  %s170_s7 = int_to_ptr.vmem [resolvable:$true] %s169_s7 }
  0x17   : > { %1728 = sst [smem:[#allocation14_spill]] %s1727_s30  ;;  %p1005_p0 = scmp.lt.s32.totalorder %s1249_s22, 4 }
  0x18   : > { %s1729_s5 = scalar_select %p1363_p12, 1, 0 }
  0x19   : > { %p992_p13 = pneg %p1363_p12  ;;  %p1378_p2 = pnand %p1005_p0, %p1343_p5 }
  0x1a   : > { %s1106_s10 = scalar_lea.vmem %s170_s7, 2048  ;;  %p1114_p9 = scmp.lt.s32.totalorder %s170_s7, %s170_s7 }
  0x1b   : > { %p1372_p1 = pnand %p992_p13, %p1339_p3  ;;  %p1107_p6 = scmp.ne.s32.totalorder %s170_s7, %s1106_s10 }
  0x1c   : > { %p1115_p8 = scmp.lt.s32.totalorder %s1106_s10, %s1106_s10 }
  0x1d   : > { %p1097_p4 = pneg %p1372_p1 }
  0x1e   : > { %p1116_p7 = por %p1115_p8, %p1114_p9 }
  0x1f   : > { %p1109_p10 = pnand %p1107_p6, %p1097_p4 }
  0x21   : > { %p1110_p11 = pneg %p1109_p10 }
  0x23   : > { %p1117_p12 = pnand %p1116_p7, %p1110_p11 }
  0x25   : > { %1120 = shalt.err (!%p1117_p12)
}
  0x26   : > { %s1710_s11 = smov 256   ;;  %s1253_s12 = smov 16  }
  0x27   : > { %s1732_s1 = sld [smem:[#allocation17_spill]]  ;;  %s30_s23 = sadd.s32 1, %s1241_s20 }
  0x28   : > { %p31_p5 = scmp.ge.s32.totalorder %s30_s23, 2  ;;  %s33_s24 = sadd.s32 1, %s1245_s21 }
  0x29   : > { %s189_s27 = sand.u32 1, %s1229_s17   ;;  %s982_s6 = smul.u32 48, %s1245_s21 }
  0x2a   : > { %s1755_s23 = smov (%p31_p5, %s30_s23), 0  ;;  %s1757_s24 = smov (!%p31_p5, %s33_s24), %s1245_s21 }
  0x2b   : > { %1733 = sst [smem:[#allocation15_spill]] %s1755_s23  ;;  %s38_s10 = ssub.s32 %s1241_s20, %s1755_s23 }
  0x2c   : > { %p35_p7 = scmp.ge.s32.totalorder %s1757_s24, 2  ;;  %s981_s8 = smul.u32 192, %s189_s27 }
  0x2d   : > { %995 = dma.hbm_to_vmem [thread:$0]  (!%p1372_p1), %s1732_s1, 2048, %s170_s7, [#allocation6], %s1710_s11, %s1710_s11, %s1253_s12  }
  0x2e   : > { %s198_s25 = sadd.s32 %s1241_s20, %s982_s6  ;;  %s1759_s24 = smov (%p35_p7, %s1757_s24), 0 }
  0x2f   : > { %1734 = sst [smem:[#allocation16_spill]] %s1759_s24  ;;  %s912_s7 = sshll.u32 %s198_s25, 7 }
  0x30   : > { %s37_s12 = ssub.s32 %s1245_s21, %s1759_s24  ;;  %s200_s11 = scalar_lea.hbm %s1702_s0, %s912_s7 }
  0x31   : > { %s39_s1 = sor.u32 %s38_s10, %s37_s12  ;;  %s193_s30 = scalar_lea.vmem [#allocation2], %s981_s8 }
  0x32   : > { %s201_s15 = sshll.u32 %s193_s30, 4  ;;  %p40_p8 = scmp.eq.s32.totalorder %s39_s1, 0  ;;  %s202_s15 = int_to_ptr.vmem [resolvable:$true] %s201_s15 }
  0x33   : > { %s1735_s22 = sadd.s32 1, %s1229_s17  ;;  %s190_s23 = scalar_lea.sflag [#allocation3], %s189_s27 }
  0x34   : > { %s1411_s29 = scalar_select %p40_p8, %s1229_s17, %s1735_s22  }
  0x35   : > { %p1123_p9 = pneg %p1378_p2  ;;  %s1134_s6 = scalar_lea.vmem %s202_s15, 3072 }
  0x36   : > { %p1135_p12 = scmp.ne.s32.totalorder %s202_s15, %s1134_s6  ;;  %s1254_s25 = smov [#allocation2]  }
  0x37   : > { %s1139_s24 = sshll.u32 %s1254_s25, 4  ;;  %s1140_s24 = int_to_ptr.vmem [resolvable:$false] %s1139_s24 }
  0x38   : > { %p1137_p13 = pnand %p1135_p12, %p1123_p9  ;;  %s1141_s13 = scalar_lea.vmem %s1140_s24, 6144 }
  0x39   : > { %p1142_p1 = scmp.lt.s32.totalorder %s202_s15, %s1140_s24  ;;  %p1143_p4 = scmp.lt.s32.totalorder %s1141_s13, %s1134_s6 }
  0x3a   : > { %p1138_p0 = pneg %p1137_p13 }
  0x3b   : > { %p1144_p6 = por %p1143_p4, %p1142_p1 }
  0x3d   : > { %p1145_p10 = pnand %p1144_p6, %p1138_p0 }
  0x3f   : > { %1148 = shalt.err (!%p1145_p10)
}
  0x40   : > { %s1255_s1 = smov 128   ;;  %s1256_s22 = smov 8  }
  0x41   : > { %s1736_s30 = smov 256   ;;  %p1737_p11 = scmp.ne.s32.totalorder %s1729_s5, 0 }
  0x42   : > { %999 = dma.hbm_to_vmem [thread:$0]  (!%p1378_p2), %s200_s11, 3072, %s202_s15, %s190_s23, %s1736_s30, %s1255_s1, %s1256_s22  }
  0x43   : > { %213 = sbr.rel (%p1737_p11) target bundleno = 666 (0x29a), region = 36  ;;  %s1421_s27 = sand.u32 (!%p1737_p11), 1, %s1225_s16  }
  0x44   : > { %s983_s24 = smul.u32 (!%p1737_p11), 192, %s1421_s27  ;;  %s216_s10 = scalar_lea.sflag (!%p1737_p11), [#allocation3], %s1421_s27 }
  0x45   : > { %p1738_p5 = scmp.ne.s32.totalorder (!%p1737_p11), %s1724_s28, 0 }
  0x46   : > { %s1425_s8 = scalar_lea.vmem (!%p1737_p11), [#allocation2], %s983_s24 }
  0x48   : > { %1208 = dma.done.wait (%p1738_p5), %s216_s10, 3072  }
  0x49   : > { %1210 = vsyncadd (%p1738_p5), %s216_s10, 4294964224 }
  0x4a   : > { %1212 = dma.done.wait (%p1339_p3), [#allocation6], 2048  }
  0x4b   : > { %1214 = vsyncadd (%p1339_p3), [#allocation6], 4294965248  ;;  %v1257_v0 = vmov 0.0   ;;  %v1258_v1 = vmov 0   ;;  %v1437_v2 = vld [vmem:[%s1425_s8 + $0x78] sm:$0xff]  ;;  %v1440_v3 = vld [vmem:[%s1425_s8 + $0x70] sm:$0xff] }
  0x4c   : > { %369 = vmatprep.subr.mxu0 %v1257_v0  ;;  %1086 = vset.pattern.permute.xlu1 %v1258_v1  ;;  %v1445_v4 = vld [vmem:[%s1425_s8 + $0x68] sm:$0xff]  ;;  %v1450_v5 = vld [vmem:[%s1425_s8 + $0x60] sm:$0xff]  ;;  %v1455_v6 = vld [vmem:[%s1425_s8 + $0x58] sm:$0xff]  ;;  %vm344_vm0 = vcmask 523264   ;;  %v1259_v51 = vmov 1   ;;  %v1260_v52 = vmov 2  }
  0x4d   : > { %1085 = vset.pattern.permute.xlu0 %v1258_v1  ;;  %370 = vmatpush1.msra.mxu0 %v1437_v2  ;;  %v1460_v7 = vld [vmem:[%s1425_s8 + $0x50] sm:$0xff]  ;;  %v273_v8 = vld [vmem:[#allocation5 + $0x8] sm:$0xff]  ;;  %v1471_v10 = vld [vmem:[%s1425_s8 + $0x40] sm:$0xff]  ;;  %v1261_v53 = vmov 3   ;;  %s915_s1 = sshll.u32 %s1421_s27, 6  ;;  %s933_s22 = sshll.u32 %s1237_s19, 4 }
  0x4e   : > { %371 = vmatprep.subr.mxu0 %v1257_v0  ;;  %916 = vmatprep.mubr.msk.f32.mxu0 %vm344_vm0, %v273_v8  ;;  %v1466_v9 = vld [vmem:[%s1425_s8 + $0x48] sm:$0xff]  ;;  %v1482_v12 = vld [vmem:[%s1705_s3 + $0x38] sm:$0xff]  ;;  %v1492_v14 = vld [vmem:[%s1705_s3 + $0x20] sm:$0xff]  ;;  %s1630_s30 = sadd.s32 %s1233_s18, %s933_s22  ;;  %s1632_s24 = scalar_lea.vmem [#allocation7], %s915_s1 }
  0x4f   : > { %372 = vmatpush1.msra.mxu0 %v1440_v3  ;;  %v1477_v11 = vld [vmem:[%s1705_s3 + $0x28] sm:$0xff]  ;;  %v255_v13 = vld [vmem:[%s1425_s8 + $0x38] sm:$0xff]  ;;  %341 = vperm.xlu0 %1085, %v1482_v12   ;;  %v254_v15 = vld [vmem:[%s1425_s8 + $0x30] sm:$0xff]  ;;  %s809_s10 = sshll.u32 %s1632_s24, 4  ;;  %s1739_s26 = sld [smem:[#allocation13_spill]]  ;;  %s1636_s10 = int_to_ptr.vmem [resolvable:$true] %s809_s10 }
  0x50   : > { %373 = vmatprep.subr.mxu0 %v1257_v0  ;;  %331 = vperm.xlu1 %1086, %v1477_v11   ;;  %v1499_v16 = vld [vmem:[%s1705_s3 + $0x30] sm:$0xff]  ;;  %v253_v17 = vld [vmem:[%s1425_s8 + $0x28] sm:$0xff]  ;;  %v252_v19 = vld [vmem:[%s1425_s8 + $0x20] sm:$0xff]  ;;  %s795_s28 = scalar_lea.sflag [#allocation4], %s1421_s27  ;;  %s1149_s5 = scalar_lea.vmem %s1636_s10, 1024 }
  0x51   : > { %374 = vmatpush1.msra.mxu0 %v1445_v4  ;;  %v1508_v18 = vld [vmem:[%s1705_s3 + $0x10] sm:$0xff]  ;;  %v1515_v20 = vld [vmem:[%s1705_s3 + $0x18] sm:$0xff]  ;;  %v1524_v22 = vld [vmem:[%s1705_s3] sm:$0xff]  ;;  %p1150_p3 = scmp.ne.s32.totalorder %s1636_s10, %s1149_s5  ;;  %s1262_s9 = smov [#allocation7]  }
  0x52   : > { %375 = vmatprep.subr.mxu0 %v1257_v0  ;;  %v251_v21 = vld [vmem:[%s1425_s8 + $0x18] sm:$0xff]  ;;  %v250_v23 = vld [vmem:[%s1425_s8 + $0x10] sm:$0xff]  ;;  %v1531_v24 = vld [vmem:[%s1705_s3 + $0x8] sm:$0xff]  ;;  %s1153_s11 = sshll.u32 %s1262_s9, 4  ;;  %s1154_s11 = int_to_ptr.vmem [resolvable:$false] %s1153_s11 }
  0x53   : > { %376 = vmatpush1.msra.mxu0 %v1450_v5  ;;  %336 = vperm.xlu0 %1085, %v1499_v16   ;;  %v249_v25 = vld [vmem:[%s1425_s8 + $0x8] sm:$0xff]  ;;  %v248_v26 = vld [vmem:[%s1425_s8] sm:$0xff]  ;;  %v271_v27 = vld [vmem:[%s1425_s8 + $0xb8] sm:$0xff]  ;;  %s1155_s23 = scalar_lea.vmem %s1154_s11, 2048  ;;  %p1156_p9 = scmp.lt.s32.totalorder %s1636_s10, %s1154_s11 }
  0x54   : > { %377 = vmatprep.subr.mxu0 %v1257_v0  ;;  %326 = vperm.xlu1 %1086, %v1492_v14   ;;  %v270_v28 = vld [vmem:[%s1425_s8 + $0xb0] sm:$0xff]  ;;  %v269_v29 = vld [vmem:[%s1425_s8 + $0xa8] sm:$0xff]  ;;  %v268_v30 = vld [vmem:[%s1425_s8 + $0xa0] sm:$0xff]  ;;  %p1157_p12 = scmp.lt.s32.totalorder %s1155_s23, %s1149_s5 }
  0x55   : > { %378 = vmatpush1.msra.mxu0 %v1455_v6  ;;  %v267_v31 = vld [vmem:[%s1425_s8 + $0x98] sm:$0xff]  ;;  %v266_v32 = vld [vmem:[%s1425_s8 + $0x90] sm:$0xff]  ;;  %v265_v33 = vld [vmem:[%s1425_s8 + $0x88] sm:$0xff]  ;;  %p1740_p2 = scmp.ne.s32.totalorder %s1739_s26, 0 }
  0x56   : > { %379 = vmatprep.subr.mxu0 %v1257_v0  ;;  %v264_v34 = vld [vmem:[%s1425_s8 + $0x80] sm:$0xff]  ;;  %v275_v36 = vld [vmem:[#allocation5 + $0x18] sm:$0xff]  ;;  %v274_v37 = vld [vmem:[#allocation5 + $0x10] sm:$0xff]  ;;  %s934_s8 = sshll.u32 %s1630_s30, 7  ;;  %p1158_p13 = por %p1157_p12, %p1156_p9 }
  0x57   : > { %380 = vmatpush1.msra.mxu0 %v1460_v7  ;;  %321 = vperm.xlu0 %1085, %v1515_v20   ;;  %v272_v35 = vld [vmem:[#allocation5] sm:$0xff]  ;;  %v277_v38 = vld [vmem:[#allocation5 + $0x28] sm:$0xff]  ;;  %v279_v40 = vld [vmem:[#allocation5 + $0x38] sm:$0xff]  ;;  %s1641_s15 = scalar_lea.hbm %s1706_s4, %s934_s8  ;;  %p1151_p7 = pnand %p1150_p3, %p1740_p2 }
  0x58   : > { %381 = vmatprep.subr.mxu0 %v1257_v0  ;;  %316 = vperm.xlu1 %1086, %v1508_v18   ;;  %v276_v39 = vld [vmem:[#allocation5 + $0x20] sm:$0xff]  ;;  %v278_v41 = vld [vmem:[#allocation5 + $0x30] sm:$0xff]  ;;  %v281_v42 = vld [vmem:[#allocation5 + $0x48] sm:$0xff] }
  0x59   : > { %382 = vmatpush1.msra.mxu0 %v1466_v9  ;;  %v280_v43 = vld [vmem:[#allocation5 + $0x40] sm:$0xff]  ;;  %v283_v44 = vld [vmem:[#allocation5 + $0x58] sm:$0xff]  ;;  %v282_v45 = vld [vmem:[#allocation5 + $0x50] sm:$0xff]  ;;  %p1152_p8 = pneg %p1151_p7 }
  0x5a   : > { %383 = vmatprep.subr.mxu0 %v1257_v0  ;;  %v285_v46 = vld [vmem:[#allocation5 + $0x68] sm:$0xff]  ;;  %v284_v47 = vld [vmem:[#allocation5 + $0x60] sm:$0xff]  ;;  %v287_v48 = vld [vmem:[#allocation5 + $0x78] sm:$0xff] }
  0x5b   : > { %384 = vmatpush1.msra.mxu0 %v1471_v10  ;;  %311 = vperm.xlu0 %1085, %v1531_v24   ;;  %v286_v49 = vld [vmem:[#allocation5 + $0x70] sm:$0xff]  ;;  %v288_v50 = vld [vmem:[%s1704_s2] sm:$0xff]  ;;  %p1159_p0 = pnand %p1158_p13, %p1152_p8 }
  0x5c   : > { %385 = vmatprep.subr.mxu0 %v1257_v0  ;;  %306 = vperm.xlu1 %1086, %v1524_v22  }
  0x5d   : > { %386 = vmatpush1.msra.mxu0 %v255_v13  ;;  %969 = vmatprep.mubr.msk.f32.mxu1 %vm344_vm0, %v288_v50 }
  0x5e   : > { %387 = vmatprep.subr.mxu0 %v1257_v0 }
  0x5f   : > { %388 = vmatpush1.msra.mxu0 %v254_v15  ;;  %1087 = vset.pattern.permute.xlu0 %v1259_v51 }
  0x60   : > { %389 = vmatprep.subr.mxu0 %v1257_v0  ;;  %1088 = vset.pattern.permute.xlu1 %v1259_v51 }
  0x61   : > { %390 = vmatpush1.msra.mxu0 %v253_v17  ;;  %487 = vperm.xlu1 %1088, %v1531_v24  }
  0x62   : > { %391 = vmatprep.subr.mxu0 %v1257_v0  ;;  %483 = vperm.xlu0 %1087, %v1524_v22  }
  0x63   : > { %392 = vmatpush1.msra.mxu0 %v252_v19 }
  0x64   : > { %393 = vmatprep.subr.mxu0 %v1257_v0 }
  0x65   : > { %394 = vmatpush1.msra.mxu0 %v251_v21  ;;  %491 = vperm.xlu1 %1088, %v1508_v18  }
  0x66   : > { %395 = vmatprep.subr.mxu0 %v1257_v0  ;;  %495 = vperm.xlu0 %1087, %v1515_v20  }
  0x67   : > { %396 = vmatpush1.msra.mxu0 %v250_v23 }
  0x68   : > { %397 = vmatprep.subr.mxu0 %v1257_v0 }
  0x69   : > { %398 = vmatpush1.msra.mxu0 %v249_v25  ;;  %499 = vperm.xlu1 %1088, %v1492_v14  }
  0x6a   : > { %399 = vmatprep.subr.mxu0 %v1257_v0  ;;  %503 = vperm.xlu0 %1087, %v1477_v11  }
  0x6b   : > { %400 = vmatpush1.msra.mxu0 %v248_v26 }
  0x6c   : > { %417 = vmatprep.subr.mxu0 %v1257_v0 }
  0x6d   : > { %418 = vmatpush2.msra.mxu0 %v271_v27  ;;  %507 = vperm.xlu1 %1088, %v1499_v16  }
  0x6e   : > { %419 = vmatprep.subr.mxu0 %v1257_v0  ;;  %511 = vperm.xlu0 %1087, %v1482_v12  }
  0x6f   : > { %420 = vmatpush2.msra.mxu0 %v270_v28 }
  0x70   : > { %421 = vmatprep.subr.mxu0 %v1257_v0 }
  0x71   : > { %422 = vmatpush2.msra.mxu0 %v269_v29  ;;  %1089 = vset.pattern.permute.xlu1 %v1260_v52 }
  0x72   : > { %423 = vmatprep.subr.mxu0 %v1257_v0  ;;  %1090 = vset.pattern.permute.xlu0 %v1260_v52 }
  0x73   : > { %424 = vmatpush2.msra.mxu0 %v268_v30  ;;  %707 = vperm.xlu1 %1089, %v1524_v22  }
  0x74   : > { %425 = vmatprep.subr.mxu0 %v1257_v0  ;;  %711 = vperm.xlu0 %1090, %v1531_v24  }
  0x75   : > { %426 = vmatpush2.msra.mxu0 %v267_v31 }
  0x76   : > { %427 = vmatprep.subr.mxu0 %v1257_v0 }
  0x77   : > { %428 = vmatpush2.msra.mxu0 %v266_v32  ;;  %715 = vperm.xlu1 %1089, %v1508_v18  }
  0x78   : > { %429 = vmatprep.subr.mxu0 %v1257_v0  ;;  %723 = vperm.xlu0 %1090, %v1492_v14  }
  0x79   : > { %430 = vmatpush2.msra.mxu0 %v265_v33 }
  0x7a   : > { %431 = vmatprep.subr.mxu0 %v1257_v0 }
  0x7b   : > { %432 = vmatpush2.msra.mxu0 %v264_v34  ;;  %719 = vperm.xlu1 %1089, %v1515_v20  }
  0x7c   : > { %434 = vmatmul.mubr.f32.vlgmr.msra.gmra.mxu0 %v272_v35  ;;  %731 = vperm.xlu0 %1090, %v1499_v16  }
  0x7d   : > { %917 = vmatprep.mubr.msk.f32.mxu0 %vm344_vm0, %v275_v36 }
  0x7f   : > { %727 = vperm.xlu1 %1089, %v1477_v11  }
  0x80   : > { %439 = vmatmul.mubr.f32.gmra.mxu0 %v274_v37  ;;  %1091 = vset.pattern.permute.xlu0 %v1261_v53 }
  0x81   : > { %918 = vmatprep.mubr.msk.f32.mxu0 %vm344_vm0, %v277_v38  ;;  %747 = vperm.xlu0 %1091, %v1524_v22   ;;  %v289_v38 = vld [vmem:[%s1704_s2 + $0x8] sm:$0xff] }
  0x83   : > { %735 = vperm.xlu1 %1089, %v1482_v12  }
  0x84   : > { %444 = vmatmul.mubr.f32.gmra.mxu0 %v276_v39  ;;  %v290_v39 = vld [vmem:[%s1704_s2 + $0x10] sm:$0xff] }
  0x85   : > { %919 = vmatprep.mubr.msk.f32.mxu0 %vm344_vm0, %v279_v40  ;;  %759 = vperm.xlu0 %1091, %v1515_v20   ;;  %v291_v40 = vld [vmem:[%s1704_s2 + $0x18] sm:$0xff] }
  0x87   : > { %1092 = vset.pattern.permute.xlu1 %v1261_v53 }
  0x88   : > { %449 = vmatmul.mubr.f32.gmra.mxu0 %v278_v41  ;;  %751 = vperm.xlu1 %1092, %v1531_v24   ;;  %v292_v41 = vld [vmem:[%s1704_s2 + $0x20] sm:$0xff] }
  0x89   : > { %920 = vmatprep.mubr.msk.f32.mxu0 %vm344_vm0, %v281_v42  ;;  %767 = vperm.xlu0 %1091, %v1477_v11   ;;  %v293_v42 = vld [vmem:[%s1704_s2 + $0x28] sm:$0xff] }
  0x8c   : > { %454 = vmatmul.mubr.f32.gmra.mxu0 %v280_v43  ;;  %755 = vperm.xlu1 %1092, %v1508_v18   ;;  %v294_v43 = vld [vmem:[%s1704_s2 + $0x30] sm:$0xff] }
  0x8d   : > { %921 = vmatprep.mubr.msk.f32.mxu0 %vm344_vm0, %v283_v44  ;;  %775 = vperm.xlu0 %1091, %v1482_v12   ;;  %v295_v44 = vld [vmem:[%s1704_s2 + $0x38] sm:$0xff] }
  0x90   : > { %459 = vmatmul.mubr.f32.gmra.mxu0 %v282_v45  ;;  %763 = vperm.xlu1 %1092, %v1492_v14  }
  0x91   : > { %922 = vmatprep.mubr.msk.f32.mxu0 %vm344_vm0, %v285_v46 }
  0x94   : > { %464 = vmatmul.mubr.f32.gmra.mxu0 %v284_v47  ;;  %771 = vperm.xlu1 %1092, %v1499_v16  }
  0x95   : > { %923 = vmatprep.mubr.msk.f32.mxu0 %vm344_vm0, %v287_v48 }
  0x98   : > { %469 = vmatmul.mubr.f32.gmra.mxu0 %v286_v49 }
  0xca   : > { %v342_v63 = vpop.permute.xlu0 %341 }
  0xcb   : > { %v332_v1 = vpop.permute.xlu1 %331 }
  0xce   : > { %v337_v13 = vpop.permute.xlu0 %336 }
  0xcf   : > { %v327_v15 = vpop.permute.xlu1 %326 }
  0xd2   : > { %v322_v19 = vpop.permute.xlu0 %321 }
  0xd3   : > { %v317_v23 = vpop.permute.xlu1 %316 }
  0xd6   : > { %v312_v28 = vpop.permute.xlu0 %311 }
  0xd7   : > { %v307_v31 = vpop.permute.xlu1 %306 }
  0xdc   : > { %v488_v45 = vpop.permute.xlu1 %487 }
  0xdd   : > { %v484_v46 = vpop.permute.xlu0 %483 }
  0xe0   : > { %v492_v48 = vpop.permute.xlu1 %491 }
  0xe1   : > { %v496_v49 = vpop.permute.xlu0 %495 }
 0x13c   : > { %v435_v54 = vpop.f32.mrf.mxu0 }
 0x13d   : > { %v436_v34 = vadd.f32 %v435_v54, %v307_v31 }
 0x13e   : > { %v437_v55 = vpop.f32.mrf.mxu0 }
 0x13f   : > { %v474_v37 = vmax.f32 %v436_v34, 0.0 }
 0x140   : > { %v440_v56 = vpop.f32.mrf.mxu0 }
 0x141   : > { %v441_v32 = vadd.f32 %v440_v56, %v312_v28  ;;  %v500_v56 = vpop.permute.xlu1 %499 }
 0x142   : > { %v442_v57 = vpop.f32.mrf.mxu0 }
 0x143   : > { %v475_v36 = vmax.f32 %v441_v32, 0.0 }
 0x144   : > { %v445_v58 = vpop.f32.mrf.mxu0 }
 0x145   : > { %v446_v29 = vadd.f32 %v445_v58, %v317_v23 }
 0x146   : > { %v447_v59 = vpop.f32.mrf.mxu0 }
 0x147   : > { %v476_v35 = vmax.f32 %v446_v29, 0.0 }
 0x148   : > { %v450_v60 = vpop.f32.mrf.mxu0 }
 0x149   : > { %v451_v26 = vadd.f32 %v450_v60, %v322_v19  ;;  %v504_v60 = vpop.permute.xlu0 %503 }
 0x14a   : > { %v452_v61 = vpop.f32.mrf.mxu0 }
 0x14b   : > { %v477_v33 = vmax.f32 %v451_v26, 0.0 }
 0x14c   : > { %v455_v62 = vpop.f32.mrf.mxu0 }
 0x14d   : > { %v456_v24 = vadd.f32 %v455_v62, %v327_v15  ;;  %v508_v15 = vpop.permute.xlu1 %507 }
 0x14e   : > { %v457_v0 = vpop.f32.mrf.mxu0 }
 0x14f   : > { %v478_v30 = vmax.f32 %v456_v24, 0.0 }
 0x150   : > { %v460_v8 = vpop.f32.mrf.mxu0 }
 0x151   : > { %v461_v21 = vadd.f32 %v460_v8, %v332_v1 }
 0x152   : > { %v462_v11 = vpop.f32.mrf.mxu0 }
 0x153   : > { %v479_v27 = vmax.f32 %v461_v21, 0.0 }
 0x154   : > { %v465_v12 = vpop.f32.mrf.mxu0 }
 0x155   : > { %v466_v16 = vadd.f32 %v465_v12, %v337_v13 }
 0x156   : > { %v467_v14 = vpop.f32.mrf.mxu0 }
 0x157   : > { %v480_v25 = vmax.f32 %v466_v16, 0.0 }
 0x158   : > { %v470_v17 = vpop.f32.mrf.mxu0 }
 0x159   : > { %v471_v18 = vadd.f32 %v470_v17, %v342_v63  ;;  %v512_v17 = vpop.permute.xlu0 %511 }
 0x15a   : > { %v472_v20 = vpop.f32.mrf.mxu0 }
 0x15b   : > { %v481_v22 = vmax.f32 %v471_v18, 0.0 }
 0x15d   : > { %953 = vmatprep.subr.mxu1 %v481_v22 }
 0x15e   : > { %954 = vmatpush3.msra.mxu1 %v481_v22 }
 0x15f   : > { %955 = vmatprep.subr.mxu1 %v480_v25 }
 0x160   : > { %956 = vmatpush3.msra.mxu1 %v480_v25 }
 0x161   : > { %957 = vmatprep.subr.mxu1 %v479_v27 }
 0x162   : > { %958 = vmatpush3.msra.mxu1 %v479_v27 }
 0x163   : > { %959 = vmatprep.subr.mxu1 %v478_v30 }
 0x164   : > { %960 = vmatpush3.msra.mxu1 %v478_v30 }
 0x165   : > { %961 = vmatprep.subr.mxu1 %v477_v33 }
 0x166   : > { %962 = vmatpush3.msra.mxu1 %v477_v33 }
 0x167   : > { %963 = vmatprep.subr.mxu1 %v476_v35 }
 0x168   : > { %964 = vmatpush3.msra.mxu1 %v476_v35 }
 0x169   : > { %965 = vmatprep.subr.mxu1 %v475_v36 }
 0x16a   : > { %966 = vmatpush3.msra.mxu1 %v475_v36 }
 0x16b   : > { %967 = vmatprep.subr.mxu1 %v474_v37 }
 0x16c   : > { %968 = vmatpush3.msra.mxu1 %v474_v37 }
 0x16d   : > { %970 = vmatmul.mubr.msk.f32.vlgmr.msra.gmra.mxu1 %vm344_vm0, %v289_v38 }
 0x16e   : > { %972 = vmatprep.mubr.msk.f32.mxu1 %vm344_vm0, %v290_v39 }
 0x171   : > { %973 = vmatmul.mubr.msk.f32.gmra.mxu1 %vm344_vm0, %v291_v40 }
 0x172   : > { %975 = vmatprep.mubr.msk.f32.mxu1 %vm344_vm0, %v292_v41 }
 0x175   : > { %976 = vmatmul.mubr.msk.f32.gmra.mxu1 %vm344_vm0, %v293_v42 }
 0x176   : > { %978 = vmatprep.mubr.msk.f32.mxu1 %vm344_vm0, %v294_v43 }
 0x179   : > { %979 = vmatmul.mubr.msk.f32.gmra.mxu1 %vm344_vm0, %v295_v44 }
 0x22d   : > { %v971_v47 = vpop.f32.mrf.mxu1 }
 0x22e   : > { %v610_v51 = vadd.f32 %v971_v47, %v488_v45 }
 0x22f   : > { %v604_v50 = vpop.f32.mrf.mxu1 }
 0x230   : > { %v605_v52 = vadd.f32 %v604_v50, %v484_v46  ;;  %v644_v57 = vadd.f32 %v610_v51, %v1466_v9 }
 0x231   : > { %v974_v53 = vpop.f32.mrf.mxu1 }
 0x232   : > { %v643_v54 = vadd.f32 %v605_v52, %v1471_v10  ;;  %v620_v58 = vadd.f32 %v974_v53, %v496_v49  ;;  %v712_v52 = vpop.permute.xlu0 %711 }
 0x233   : > { %v614_v55 = vpop.f32.mrf.mxu1 }
 0x234   : > { %v615_v59 = vadd.f32 %v614_v55, %v492_v48  ;;  %v651_v62 = vadd.f32 %v644_v57, %v643_v54  ;;  %v646_v1 = vadd.f32 %v620_v58, %v1455_v6 }
 0x235   : > { %v977_v61 = vpop.f32.mrf.mxu1 }
 0x236   : > { %v645_v63 = vadd.f32 %v615_v59, %v1460_v7  ;;  %v630_v11 = vadd.f32 %v977_v61, %v504_v60 }
 0x237   : > { %v624_v0 = vpop.f32.mrf.mxu1 }
 0x238   : > { %v652_v8 = vadd.f32 %v651_v62, %v645_v63  ;;  %v625_v13 = vadd.f32 %v624_v0, %v500_v56  ;;  %v648_v16 = vadd.f32 %v630_v11, %v1445_v4 }
 0x239   : > { %v980_v12 = vpop.f32.mrf.mxu1 }
 0x23a   : > { %v647_v10 = vadd.f32 %v625_v13, %v1450_v5  ;;  %v653_v14 = vadd.f32 %v652_v8, %v646_v1  ;;  %v640_v19 = vadd.f32 %v980_v12, %v512_v17 }
 0x23b   : > { %v634_v9 = vpop.f32.mrf.mxu1 }
 0x23c   : > { %v654_v18 = vadd.f32 %v653_v14, %v647_v10  ;;  %v635_v20 = vadd.f32 %v634_v9, %v508_v15  ;;  %v650_v6 = vadd.f32 %v640_v19, %v1437_v2  ;;  %v708_v2 = vpop.permute.xlu1 %707 }
 0x23e   : > { %v649_v7 = vadd.f32 %v635_v20, %v1440_v3  ;;  %v655_v21 = vadd.f32 %v654_v18, %v648_v16 }
 0x240   : > { %v656_v22 = vadd.f32 %v655_v21, %v649_v7  ;;  %v716_v48 = vpop.permute.xlu1 %715 }
 0x242   : > { %v657_v23 = vadd.f32 %v656_v22, %v650_v6 }
 0x244   : > { %v658_v24 = vrot.slane %v657_v23, 4 }
 0x246   : > { %v659_v25 = vadd.f32 %v658_v24, %v657_v23 }
 0x248   : > { %v660_v26 = vrot.slane %v659_v25, 2 }
 0x24a   : > { %v661_v27 = vadd.f32 %v660_v26, %v659_v25 }
 0x24c   : > { %v662_v5 = vrot.slane %v661_v27, 1 }
 0x24e   : > { %v663_v28 = vadd.f32 %v662_v5, %v661_v27 }
 0x250   : > { %v665_v29 = vmul.f32 0.015625, %v663_v28 }
 0x252   : > { %v667_v30 = vsub.f32 %v644_v57, %v665_v29  ;;  %v668_v31 = vsub.f32 %v645_v63, %v665_v29  ;;  %v666_v4 = vsub.f32 %v643_v54, %v665_v29  ;;  %v669_v33 = vsub.f32 %v646_v1, %v665_v29  ;;  %v720_v54 = vpop.permute.xlu1 %719  ;;  %v724_v57 = vpop.permute.xlu0 %723 }
 0x253   : > { %v670_v35 = vsub.f32 %v647_v10, %v665_v29  ;;  %v671_v37 = vsub.f32 %v648_v16, %v665_v29  ;;  %v672_v40 = vsub.f32 %v649_v7, %v665_v29  ;;  %v673_v43 = vsub.f32 %v650_v6, %v665_v29 }
 0x254   : > { %v675_v32 = vmul.f32 %v667_v30, %v667_v30  ;;  %v674_v34 = vmul.f32 %v666_v4, %v666_v4  ;;  %v676_v3 = vmul.f32 %v668_v31, %v668_v31  ;;  %v677_v38 = vmul.f32 %v669_v33, %v669_v33 }
 0x255   : > { %v678_v41 = vmul.f32 %v670_v35, %v670_v35  ;;  %v679_v44 = vmul.f32 %v671_v37, %v671_v37  ;;  %v680_v46 = vmul.f32 %v672_v40, %v672_v40  ;;  %v681_v49 = vmul.f32 %v673_v43, %v673_v43 }
 0x256   : > { %v682_v36 = vadd.f32 %v675_v32, %v674_v34  ;;  %v728_v59 = vpop.permute.xlu1 %727  ;;  %v732_v62 = vpop.permute.xlu0 %731 }
 0x258   : > { %v683_v39 = vadd.f32 %v682_v36, %v676_v3 }
 0x25a   : > { %v684_v42 = vadd.f32 %v683_v39, %v677_v38  ;;  %v736_v0 = vpop.permute.xlu1 %735  ;;  %v748_v8 = vpop.permute.xlu0 %747 }
 0x25c   : > { %v685_v45 = vadd.f32 %v684_v42, %v678_v41 }
 0x25e   : > { %v686_v47 = vadd.f32 %v685_v45, %v679_v44  ;;  %v752_v11 = vpop.permute.xlu1 %751  ;;  %v760_v13 = vpop.permute.xlu0 %759 }
 0x260   : > { %v687_v50 = vadd.f32 %v686_v47, %v680_v46 }
 0x262   : > { %v688_v51 = vadd.f32 %v687_v50, %v681_v49  ;;  %v756_v12 = vpop.permute.xlu1 %755  ;;  %v768_v15 = vpop.permute.xlu0 %767 }
 0x264   : > { %v689_v53 = vrot.slane %v688_v51, 4 }
 0x266   : > { %v690_v55 = vadd.f32 %v689_v53, %v688_v51  ;;  %v764_v10 = vpop.permute.xlu1 %763 }
 0x268   : > { %v691_v56 = vrot.slane %v690_v55, 2 }
 0x26a   : > { %v692_v58 = vadd.f32 %v691_v56, %v690_v55  ;;  %v772_v32 = vpop.permute.xlu1 %771 }
 0x26c   : > { %v693_v60 = vrot.slane %v692_v58, 1 }
 0x26e   : > { %v694_v61 = vadd.f32 %v693_v60, %v692_v58 }
 0x270   : > { %v695_v63 = vmul.f32 0.015625, %v694_v61 }
 0x272   : > { %v696_v1 = vadd.f32 1e-05, %v695_v63 }
 0x274   : > { %1093 = vrsqrt.f32 %v696_v1 }
 0x281   : > { %v1094_v14 = vpop.eup %1093 }
 0x282   : > { %v698_v17 = vmul.f32 %v1094_v14, %v666_v4  ;;  %v700_v9 = vmul.f32 %v1094_v14, %v668_v31  ;;  %v701_v16 = vmul.f32 %v1094_v14, %v669_v33  ;;  %v703_v18 = vmul.f32 %v1094_v14, %v671_v37  ;;  %v776_v4 = vpop.permute.xlu0 %775 }
 0x283   : > { %v699_v19 = vmul.f32 %v1094_v14, %v667_v30  ;;  %v705_v20 = vmul.f32 %v1094_v14, %v673_v43  ;;  %v702_v7 = vmul.f32 %v1094_v14, %v670_v35  ;;  %v704_v21 = vmul.f32 %v1094_v14, %v672_v40 }
 0x284   : > { %v738_v6 = vmul.f32 %v708_v2, %v698_v17  ;;  %v740_v22 = vmul.f32 %v716_v48, %v700_v9  ;;  %v741_v23 = vmul.f32 %v720_v54, %v701_v16  ;;  %v743_v24 = vmul.f32 %v728_v59, %v703_v18 }
 0x285   : > { %v739_v25 = vmul.f32 %v712_v52, %v699_v19  ;;  %v745_v26 = vmul.f32 %v736_v0, %v705_v20  ;;  %v742_v27 = vmul.f32 %v724_v57, %v702_v7  ;;  %v744_v5 = vmul.f32 %v732_v62, %v704_v21 }
 0x286   : > { %v778_v28 = vadd.f32 %v748_v8, %v738_v6  ;;  %v781_v29 = vadd.f32 %v760_v13, %v741_v23  ;;  %v780_v30 = vadd.f32 %v756_v12, %v740_v22  ;;  %v783_v31 = vadd.f32 %v768_v15, %v743_v24 }
 0x287   : > { %v779_v33 = vadd.f32 %v752_v11, %v739_v25  ;;  %v782_v34 = vadd.f32 %v764_v10, %v742_v27  ;;  %v785_v35 = vadd.f32 %v776_v4, %v745_v26  ;;  %v784_v3 = vadd.f32 %v772_v32, %v744_v5 }
 0x288   : > { %786 = vst [vmem:[%s1632_s24] sm:$0xff] %v778_v28  ;;  %789 = vst [vmem:[%s1632_s24 + $0x18] sm:$0xff] %v781_v29 }
 0x289   : > { %788 = vst [vmem:[%s1632_s24 + $0x10] sm:$0xff] %v780_v30  ;;  %791 = vst [vmem:[%s1632_s24 + $0x28] sm:$0xff] %v783_v31 }
 0x28a   : > { %787 = vst [vmem:[%s1632_s24 + $0x8] sm:$0xff] %v779_v33  ;;  %790 = vst [vmem:[%s1632_s24 + $0x20] sm:$0xff] %v782_v34 }
 0x28b   : > { %793 = vst [vmem:[%s1632_s24 + $0x38] sm:$0xff] %v785_v35  ;;  %792 = vst [vmem:[%s1632_s24 + $0x30] sm:$0xff] %v784_v3 }
 0x28c   : > { %1162 = shalt.err (!%p1159_p0)
}
 0x28d   : > { %s1163_s7 = scalar_lea.hbm %s1641_s15, 1024  ;;  %s1167_s6 = scalar_lea.hbm %s1706_s4, 4096 }
 0x28e   : > { %p1164_p1 = scmp.ne.s32.totalorder %s1641_s15, %s1163_s7  ;;  %p1168_p10 = scmp.lt.s32.totalorder %s1641_s15, %s1706_s4 }
 0x28f   : > { %p1169_p11 = scmp.lt.s32.totalorder %s1167_s6, %s1163_s7 }
 0x290   : > { %p1165_p4 = pnand %p1164_p1, %p1740_p2 }
 0x291   : > { %p1170_p5 = por %p1169_p11, %p1168_p10 }
 0x292   : > { %p1166_p6 = pneg %p1165_p4 }
 0x294   : > { %p1171_p3 = pnand %p1170_p5, %p1166_p6 }
 0x296   : > { %1174 = shalt.err (!%p1171_p3)
}
 0x297   : > { %s1263_s1 = smov 128   ;;  %s1264_s22 = smov 256  }
 0x298   : > { %s1265_s30 = smov 8  }
 0x299   : > { %990 = dma.vmem_to_hbm [thread:$0]  (%p1740_p2), %s1636_s10, 1024, %s1641_s15, %s795_s28, %s1263_s1, %s1264_s22, %s1265_s30  }
 0x29a PF: > { %s1741_s24 = sld [smem:[#allocation12_spill]] }
 0x29b   : > { %s1742_s8 = sld [smem:[#allocation11_spill]] }
 0x29c   : > { %s1743_s18 = sld [smem:[#allocation14_spill]] }
 0x2a0   : > { %p1007_p7 = scmp.ge.s32.totalorder %s1741_s24, 2 }
 0x2a1   : > { %s824_s19 = sand.u32 1, %s1742_s8  }
 0x2a2   : > { %p1744_p8 = scmp.ne.s32.totalorder %s1743_s18, 0  ;;  %s825_s5 = scalar_lea.sflag [#allocation4], %s824_s19 }
 0x2a4   : > { %p1001_p9 = pnand %p1007_p7, %p1744_p8 }
 0x2a6   : > { %p1002_p12 = pneg %p1001_p9 }
 0x2a8   : > { %1216 = dma.done.wait (%p1002_p12), %s825_s5, 1024  }
 0x2a9   : > { %1218 = vsyncadd (%p1002_p12), %s825_s5, 4294966272  ;;  %s21_s22 = sadd.s32 1, %s1741_s24   ;;  %s1745_s27 = sld [smem:[#allocation15_spill]] }
 0x2aa   : > { %p18_p13 = scmp.ge.s32.totalorder %s21_s22, 6   ;;  %s1746_s10 = sld [smem:[#allocation16_spill]] }
 0x2ab   : > { %s1747_s15 = smov %s1225_s16  ;;  %s1748_s16 = smov %s1229_s17 }
 0x2ac   : > { %s1749_s17 = smov %s1411_s29  ;;  %s1750_s18 = smov %s1241_s20 }
 0x2ad   : > { %s1751_s19 = smov %s1245_s21  ;;  %20 = sbr.rel (!%p18_p13) target bundleno = 10 (0xa), region = 85 }
 0x2af   : > { %s1752_s20 = smov %s1745_s27 }
 0x2b0   : > { %s1753_s21 = smov %s1746_s10 }
 0x2b2   :  { %830 = vsyncpa [#allocation3], 1 }
 0x2b3   :  { %832 = vsyncpa [#allocation3 + $0x1], 1 }
 0x2b4   :  { %833 = vsyncpa [#allocation6], 1 }
 0x2b5   :  { %834 = vsyncpa [#allocation4], 1 }
 0x2b6   :  { %836 = vsyncpa [#allocation4 + $0x1], 1 }

</bundles_post_ra>
